<compile_context>
chip_gen: v6e
topology: v6e:2x2x1
jax: 0.10.0
libtpu: 0.0.40
codegen_flags: <defaults>
</compile_context>

<pallas_src>
import jax
import jax.numpy as jnp
from jax.experimental import pallas as pl
from jax.experimental.pallas import tpu as pltpu


def _round_up(x, m):
    return ((x + m - 1) // m) * m


# ------------- fused concat + Linear (channel-first, single contraction) -------------
def _make_down_channel_kernel(num_ex_modals, c0):
    def kernel(*refs):
        x_refs = refs[:num_ex_modals]                  # each (1, C0, Thw)
        w_ref = refs[num_ex_modals]                    # (Cout, E*C0)   VMEM-resident
        b_ref = refs[num_ex_modals + 1]                # (Cout, 1)      VMEM-resident
        o_ref = refs[num_ex_modals + 2]                # (1, Cout, Thw)
        xcat_ref = refs[num_ex_modals + 3]             # scratch (E*C0, Thw)

        # Fused channel concat: stage the E modality tiles contiguously in VMEM
        # (static sublane-aligned slices; C0 is a multiple of 8).
        for e in range(num_ex_modals):
            xcat_ref[e * c0:(e + 1) * c0, :] = x_refs[e][0]

        # Single K = E*C0 MXU contraction with f32 accumulation.
        acc = jnp.dot(w_ref[...], xcat_ref[...], preferred_element_type=jnp.float32)
        o_ref[0] = (acc + b_ref[...]).astype(o_ref.dtype)

    return kernel


def _pick_hw_tile(hw, batch, k_total, c_out, itemsize):
    """Fixed large lane-dense tile used with a cdiv grid (ragged edge is masked)."""
    if hw <= 128:
        return hw                              # full extent (always legal)
    try:
        vmem_cap = pltpu.get_tpu_info().vmem_capacity_bytes
    except Exception:
        vmem_cap = 64 * 1024 * 1024            # assume smallest generation (v7x per-TC)
    # Keep double-buffered ins/outs + staging scratch well under the scoped limit.
    budget = min(vmem_cap // 4, 24 * 1024 * 1024)
    thw = 128
    for t in (4096, 2048, 1024, 512, 256, 128):
        per_step = itemsize * t * (3 * k_total + 2 * c_out)   # 2x in + scratch + 2x out
        if per_step <= budget:
            thw = t
            break
    thw = min(thw, _round_up(hw, 128))
    if batch == 1:
        # v7x megacore: guarantee >= 2 grid steps so both TensorCores get work.
        while thw > 128 and (hw + thw - 1) // thw < 2:
            thw = max(128, _round_up(thw // 2, 128))
    return thw


def down_channel_forward(xs, w_packed, b_col):
    """xs: list of E tensors (B, C0, H, W) NCHW (f32 or bf16).
    w_packed: (C_out, E*C0)  == fc1.weight (concat order matches torch.cat(dim=1)).
    b_col:    (C_out, 1)     == fc1.bias reshaped once at init.
    Returns (B, C_out, H, W) NCHW in the input dtype."""
    E = len(xs)
    B, C0, H, W = xs[0].shape
    C_out, K = w_packed.shape
    assert K == E * C0
    HW = H * W
    itemsize = jnp.dtype(xs[0].dtype).itemsize
    thw = _pick_hw_tile(HW, B, K, C_out, itemsize)

    # (B, C0, H, W) -> (B, C0, H*W): pure reshape, no data movement.
    xs_flat = [x.reshape(B, C0, HW) for x in xs]

    grid = (B, pl.cdiv(HW, thw))
    in_specs = [pl.BlockSpec((1, C0, thw), lambda b, j: (b, 0, j)) for _ in range(E)]
    in_specs.append(pl.BlockSpec((C_out, K), lambda b, j: (0, 0)))   # resident weight
    in_specs.append(pl.BlockSpec((C_out, 1), lambda b, j: (0, 0)))   # resident bias
    out_specs = pl.BlockSpec((1, C_out, thw), lambda b, j: (b, 0, j))

    # Explicit, generation-safe scoped-VMEM limit (buffers + headroom for internals).
    act_bytes = itemsize * thw * (3 * K + 2 * C_out)
    w_bytes = 2 * jnp.dtype(w_packed.dtype).itemsize * (C_out * K + C_out)
    vmem_limit = int(act_bytes + w_bytes + (8 << 20))

    out = pl.pallas_call(
        _make_down_channel_kernel(E, C0),
        out_shape=jax.ShapeDtypeStruct((B, C_out, HW), xs[0].dtype),
        grid=grid,
        in_specs=in_specs,
        out_specs=out_specs,
        scratch_shapes=[pltpu.VMEM((K, thw), xs[0].dtype)],
        compiler_params=pltpu.CompilerParams(
            dimension_semantics=("parallel", "parallel"),
            vmem_limit_bytes=vmem_limit),
    )(*xs_flat, w_packed, b_col)

    return out.reshape(B, C_out, H, W)


def prepare_params(fc1_w, fc1_b):
    """One-time (init-time) parameter prep — fc1.weight is already in the packed
    (C_out, E*C0) layout matching torch.cat(dim=1) channel order."""
    return fc1_w, fc1_b.reshape(-1, 1)


if __name__ == "__main__":
    # Down_channel defaults: num_modals=4 -> ex_modals=3, dims[0]=96.
    num_modals = 4
    dims0 = 96
    B, H, W = 2, 16, 16
    E = num_modals - 1
    in_dim = dims0 * E          # 288
    out_dim = dims0             # 96

    key = jax.random.PRNGKey(0)
    keys = jax.random.split(key, 2 + E)
    kw, kb, kxs = keys[0], keys[1], keys[2:]

    bound = 1.0 / (in_dim ** 0.5)                       # nn.Linear default init range
    fc1_w = jax.random.uniform(kw, (out_dim, in_dim), jnp.float32, -bound, bound)
    fc1_b = jax.random.uniform(kb, (out_dim,), jnp.float32, -bound, bound)
    xs = [jax.random.normal(k, (B, dims0, H, W), jnp.float32) for k in kxs]

    w_packed, b_col = prepare_params(fc1_w, fc1_b)

    fwd = jax.jit(down_channel_forward)
    out = jax.block_until_ready(fwd(xs, w_packed, b_col))

    # pure-JAX reference: cat(dim=1) -> NHWC -> Linear -> NCHW
    x_cat = jnp.concatenate(xs, axis=1)                                     # (B, E*C0, H, W)
    ref = jnp.einsum('bchw,nc->bnhw', x_cat, fc1_w) + fc1_b[None, :, None, None]

    assert out.shape == (B, out_dim, H, W)
    assert bool(jnp.all(jnp.isfinite(out)))
    max_err = float(jnp.max(jnp.abs(out - ref)))
    assert max_err < 1e-3, f"max abs err {max_err}"
    print("KERNEL_OK")
</pallas_src>

<mosaic_0001>
module attributes {stable_mosaic.version = 11 : i64} {
  func.func @kernel(%arg0: i32, %arg1: i32, %arg2: memref<1x96x256xf32, #tpu.memory_space<vmem>>, %arg3: memref<1x96x256xf32, #tpu.memory_space<vmem>>, %arg4: memref<1x96x256xf32, #tpu.memory_space<vmem>>, %arg5: memref<96x288xf32, #tpu.memory_space<vmem>>, %arg6: memref<96x1xf32, #tpu.memory_space<vmem>>, %arg7: memref<1x96x256xf32, #tpu.memory_space<vmem>>, %arg8: memref<288x256xf32, #tpu.memory_space<vmem>>) attributes {dimension_semantics = [#tpu.dimension_semantics<parallel>, #tpu.dimension_semantics<parallel>], iteration_bounds = array<i64: 2, 1>, scalar_prefetch = 0 : i64, scratch_operands = 1 : i64, tpu.core_type = #tpu.core_type<tc>, window_params = [{transform_indices = @transform_0, window_bounds = array<i64: 1, 96, 256>}, {transform_indices = @transform_1, window_bounds = array<i64: 1, 96, 256>}, {transform_indices = @transform_2, window_bounds = array<i64: 1, 96, 256>}, {pipeline_mode = #tpu.pipeline_mode<synchronous>, transform_indices = @transform_3, window_bounds = array<i64: 96, 288>}, {pipeline_mode = #tpu.pipeline_mode<synchronous>, transform_indices = @transform_4, window_bounds = array<i64: 96, 1>}, {transform_indices = @transform_5, window_bounds = array<i64: 1, 96, 256>}]} {
    %c0 = arith.constant 0 : index
    %c0_0 = arith.constant 0 : index
    %c0_1 = arith.constant 0 : index
    %0 = vector.load %arg2[%c0, %c0_0, %c0_1] : memref<1x96x256xf32, #tpu.memory_space<vmem>>, vector<1x96x256xf32>
    %1 = vector.shape_cast %0 : vector<1x96x256xf32> to vector<96x256xf32>
    %c0_2 = arith.constant 0 : index
    %c0_3 = arith.constant 0 : index
    %2 = vector.load %arg8[%c0_2, %c0_3] : memref<288x256xf32, #tpu.memory_space<vmem>>, vector<96x256xf32>
    tpu.vector_store %arg8[%c0_2, %c0_3], %1 {strides = array<i32>} : memref<288x256xf32, #tpu.memory_space<vmem>>, vector<96x256xf32>,
    %c0_4 = arith.constant 0 : index
    %c0_5 = arith.constant 0 : index
    %c0_6 = arith.constant 0 : index
    %3 = vector.load %arg3[%c0_4, %c0_5, %c0_6] : memref<1x96x256xf32, #tpu.memory_space<vmem>>, vector<1x96x256xf32>
    %4 = vector.shape_cast %3 : vector<1x96x256xf32> to vector<96x256xf32>
    %c96 = arith.constant 96 : index
    %c0_7 = arith.constant 0 : index
    %5 = vector.load %arg8[%c96, %c0_7] : memref<288x256xf32, #tpu.memory_space<vmem>>, vector<96x256xf32>
    tpu.vector_store %arg8[%c96, %c0_7], %4 {strides = array<i32>} : memref<288x256xf32, #tpu.memory_space<vmem>>, vector<96x256xf32>,
    %c0_8 = arith.constant 0 : index
    %c0_9 = arith.constant 0 : index
    %c0_10 = arith.constant 0 : index
    %6 = vector.load %arg4[%c0_8, %c0_9, %c0_10] : memref<1x96x256xf32, #tpu.memory_space<vmem>>, vector<1x96x256xf32>
    %7 = vector.shape_cast %6 : vector<1x96x256xf32> to vector<96x256xf32>
    %c192 = arith.constant 192 : index
    %c0_11 = arith.constant 0 : index
    %8 = vector.load %arg8[%c192, %c0_11] : memref<288x256xf32, #tpu.memory_space<vmem>>, vector<96x256xf32>
    tpu.vector_store %arg8[%c192, %c0_11], %7 {strides = array<i32>} : memref<288x256xf32, #tpu.memory_space<vmem>>, vector<96x256xf32>,
    %c0_12 = arith.constant 0 : index
    %c0_13 = arith.constant 0 : index
    %9 = vector.load %arg5[%c0_12, %c0_13] : memref<96x288xf32, #tpu.memory_space<vmem>>, vector<96x288xf32>
    %c0_14 = arith.constant 0 : index
    %c0_15 = arith.constant 0 : index
    %10 = vector.load %arg8[%c0_14, %c0_15] : memref<288x256xf32, #tpu.memory_space<vmem>>, vector<288x256xf32>
    %cst = arith.constant dense<0.000000e+00> : vector<96x256xf32>
    %11 = tpu.matmul %9, %10, %cst {dimension_numbers = #tpu.dot_dimension_numbers<[1], [0], [0], [1], [0, 0, 1, 1], [], []>} : vector<96x288xf32>, vector<288x256xf32>, vector<96x256xf32> -> vector<96x256xf32>
    %c0_16 = arith.constant 0 : index
    %c0_17 = arith.constant 0 : index
    %12 = vector.load %arg6[%c0_16, %c0_17] : memref<96x1xf32, #tpu.memory_space<vmem>>, vector<96x1xf32>
    %13 = vector.broadcast %12 : vector<96x1xf32> to vector<96x256xf32>
    %14 = arith.addf %11, %13 : vector<96x256xf32>
    %c0_18 = arith.constant 0 : index
    %c0_19 = arith.constant 0 : index
    %c0_20 = arith.constant 0 : index
    %15 = vector.load %arg7[%c0_18, %c0_19, %c0_20] : memref<1x96x256xf32, #tpu.memory_space<vmem>>, vector<1x96x256xf32>
    %16 = vector.shape_cast %15 : vector<1x96x256xf32> to vector<96x256xf32>
    %17 = vector.shape_cast %14 : vector<96x256xf32> to vector<1x96x256xf32>
    tpu.vector_store %arg7[%c0_18, %c0_19, %c0_20], %17 {strides = array<i32>} : memref<1x96x256xf32, #tpu.memory_space<vmem>>, vector<1x96x256xf32>,
    return
  }
  func.func @transform_0(%arg0: i32, %arg1: i32) -> (i32, i32, i32) {
    %c0_i32 = arith.constant 0 : i32
    %c0_i32_0 = arith.constant 0 : i32
    return %arg0, %c0_i32, %arg1 : i32, i32, i32
  }
  func.func @transform_1(%arg0: i32, %arg1: i32) -> (i32, i32, i32) {
    %c0_i32 = arith.constant 0 : i32
    %c0_i32_0 = arith.constant 0 : i32
    return %arg0, %c0_i32, %arg1 : i32, i32, i32
  }
  func.func @transform_2(%arg0: i32, %arg1: i32) -> (i32, i32, i32) {
    %c0_i32 = arith.constant 0 : i32
    %c0_i32_0 = arith.constant 0 : i32
    return %arg0, %c0_i32, %arg1 : i32, i32, i32
  }
  func.func @transform_3(%arg0: i32, %arg1: i32) -> (i32, i32) {
    %c0_i32 = arith.constant 0 : i32
    %c0_i32_0 = arith.constant 0 : i32
    %c0_i32_1 = arith.constant 0 : i32
    return %c0_i32, %c0_i32_0 : i32, i32
  }
  func.func @transform_4(%arg0: i32, %arg1: i32) -> (i32, i32) {
    %c0_i32 = arith.constant 0 : i32
    %c0_i32_0 = arith.constant 0 : i32
    %c0_i32_1 = arith.constant 0 : i32
    return %c0_i32, %c0_i32_0 : i32, i32
  }
  func.func @transform_5(%arg0: i32, %arg1: i32) -> (i32, i32, i32) {
    %c0_i32 = arith.constant 0 : i32
    %c0_i32_0 = arith.constant 0 : i32
    return %arg0, %c0_i32, %arg1 : i32, i32, i32
  }
}

</mosaic_0001>

<bundles_post_ra>
// kernel: down_channel_forward.1
= control target key start
LH: loop header
LB: loop body
LE: loop exit
PB: predicated region body
PF: predicated region fallthrough
CT: control target
= control target key end

     0   :  { %s1226_s18 = smov 0   ;;  %s1228_s19 = smov 0   ;;  %s1543_s0 = inlined_call_operand.vmem [shape: f32[2,96,256], index: 0, kind: input, shape index: {}]   ;;  %s1544_s1 = inlined_call_operand.vmem [shape: f32[2,96,256], index: 1, kind: input, shape index: {}]   ;;  %s1545_s2 = inlined_call_operand.vmem [shape: f32[2,96,256], index: 2, kind: input, shape index: {}]   ;;  %s1546_s3 = inlined_call_operand.vmem [shape: f32[96,288], index: 3, kind: input, shape index: {}]   ;;  %s1547_s4 = inlined_call_operand.vmem [shape: f32[96,1], index: 4, kind: input, shape index: {}]   ;;  %s1548_s5 = inlined_call_operand.vmem [shape: f32[2,96,256], index: 5, kind: output, shape index: {}]  }
   0x1   :  { %s1230_s20 = smov 0  }
   0x2 LB: > { %s27_s21 = sadd.s32 1, %s1188_s19  ;;  %p1122_p0 = scmp.ge.s32.totalorder %s1192_s20, 1  ;;  %s1192_s20 = sphi %s1230_s20, %s15_s20   ;;  %s1188_s19 = sphi %s1228_s19, %s1550_s19   ;;  %s1184_s18 = sphi %s1226_s18, %s1549_s18  }
   0x3   : > { %p29_p1 = scmp.ge.s32.totalorder %s27_s21, 2  ;;  %p242_p2 = scmp.lt.s32.totalorder %s1192_s20, 3 }
   0x5   : > { %s1552_s21 = smov (%p29_p1, %s27_s21), 0  ;;  %p243_p3 = pnand %p1122_p0, %p242_p2 }
   0x6   : > { %p297_p4 = scmp.lt.s32.totalorder (!%p243_p3), %s1184_s18, 1 }
   0x7   : > { %246 = sbr.rel (%p243_p3) target bundleno = 325 (0x145), region = 40 }
   0xc   : > { %v481_v0 = vld [vmem:[%s1546_s3 + $0x8] sm:$0xff]  ;;  %v1194_v1 = vmov 0.0   ;;  %s1554_s18 = smov (!%p297_p4, %s1184_s18), 1  ;;  %v1195_v2 = vmov 0   ;;  %v482_v39 = vld [vmem:[%s1546_s3 + $0x10] sm:$0xff]  ;;  %vm660_vm0 = vcmask 261120  }
   0xd   : > { %761 = vmatprep.mubr.f32.mxu0 %v481_v0  ;;  %898 = vmatprep.mubr.f32.mxu1 %v1194_v1  ;;  %s1248_s24 = smul.u32 192, %s1554_s18  ;;  %v485_v43 = vld [vmem:[%s1546_s3 + $0x28] sm:$0xff]  ;;  %v588_v45 = vld [vmem:[%s1547_s4] sm:$0xff]  ;;  %v590_v46 = vld [vmem:[%s1547_s4 + $0x10] sm:$0xff] }
   0xe   : > { %1168 = vset.pattern.permute.xlu0 %v1195_v2  ;;  %1169 = vset.pattern.permute.xlu1 %v1195_v2  ;;  %v589_v49 = vld [vmem:[%s1547_s4 + $0x8] sm:$0xff]  ;;  %v591_v51 = vld [vmem:[%s1547_s4 + $0x18] sm:$0xff]  ;;  %v488_v53 = vld [vmem:[%s1546_s3 + $0x40] sm:$0xff] }
   0xf   : > { %s1254_s27 = scalar_lea.vmem %s1544_s1, %s1248_s24  ;;  %s1266_s30 = scalar_lea.vmem %s1543_s0, %s1248_s24  ;;  %602 = vperm.xlu0 %1168, %v588_v45   ;;  %612 = vperm.xlu1 %1169, %v590_v46   ;;  %v592_v56 = vld [vmem:[%s1547_s4 + $0x20] sm:$0xff]  ;;  %v593_v58 = vld [vmem:[%s1547_s4 + $0x28] sm:$0xff]  ;;  %v491_v60 = vld [vmem:[%s1546_s3 + $0x58] sm:$0xff] }
  0x10   : > { %v391_v3 = vld [vmem:[%s1254_s27 + $0x38] sm:$0xff]  ;;  %v390_v4 = vld [vmem:[%s1254_s27 + $0x30] sm:$0xff]  ;;  %v389_v5 = vld [vmem:[%s1254_s27 + $0x28] sm:$0xff]  ;;  %s1287_s8 = scalar_lea.vmem %s1545_s2, %s1248_s24  ;;  %s1508_s28 = scalar_lea.vmem %s1548_s5, %s1248_s24 }
  0x11   : > { %697 = vmatprep.subr.mxu0 %v391_v3  ;;  %v388_v6 = vld [vmem:[%s1254_s27 + $0x20] sm:$0xff]  ;;  %v387_v7 = vld [vmem:[%s1254_s27 + $0x18] sm:$0xff]  ;;  %v386_v8 = vld [vmem:[%s1254_s27 + $0x10] sm:$0xff] }
  0x12   : > { %698 = vmatpush1.msra.mxu0 %v390_v4  ;;  %v385_v9 = vld [vmem:[%s1254_s27 + $0x8] sm:$0xff]  ;;  %v384_v10 = vld [vmem:[%s1254_s27] sm:$0xff]  ;;  %v359_v11 = vld [vmem:[%s1266_s30 + $0xb8] sm:$0xff] }
  0x13   : > { %699 = vmatprep.subr.mxu0 %v389_v5  ;;  %v358_v12 = vld [vmem:[%s1266_s30 + $0xb0] sm:$0xff]  ;;  %v357_v13 = vld [vmem:[%s1266_s30 + $0xa8] sm:$0xff]  ;;  %v356_v14 = vld [vmem:[%s1266_s30 + $0xa0] sm:$0xff]  ;;  %607 = vperm.xlu0 %1168, %v589_v49  }
  0x14   : > { %700 = vmatpush1.msra.mxu0 %v388_v6  ;;  %v355_v15 = vld [vmem:[%s1266_s30 + $0x98] sm:$0xff]  ;;  %v354_v16 = vld [vmem:[%s1266_s30 + $0x90] sm:$0xff]  ;;  %v353_v17 = vld [vmem:[%s1266_s30 + $0x88] sm:$0xff]  ;;  %617 = vperm.xlu1 %1169, %v591_v51  }
  0x15   : > { %701 = vmatprep.subr.mxu0 %v387_v7  ;;  %v352_v18 = vld [vmem:[%s1266_s30 + $0x80] sm:$0xff]  ;;  %v351_v19 = vld [vmem:[%s1266_s30 + $0x78] sm:$0xff]  ;;  %v350_v20 = vld [vmem:[%s1266_s30 + $0x70] sm:$0xff] }
  0x16   : > { %702 = vmatpush1.msra.mxu0 %v386_v8  ;;  %v349_v21 = vld [vmem:[%s1266_s30 + $0x68] sm:$0xff]  ;;  %v348_v22 = vld [vmem:[%s1266_s30 + $0x60] sm:$0xff]  ;;  %v347_v23 = vld [vmem:[%s1266_s30 + $0x58] sm:$0xff] }
  0x17   : > { %703 = vmatprep.subr.mxu0 %v385_v9  ;;  %v346_v24 = vld [vmem:[%s1266_s30 + $0x50] sm:$0xff]  ;;  %v455_v25 = vld [vmem:[%s1287_s8 + $0xb8] sm:$0xff]  ;;  %v345_v27 = vld [vmem:[%s1266_s30 + $0x48] sm:$0xff]  ;;  %622 = vperm.xlu0 %1168, %v592_v56  }
  0x18   : > { %704 = vmatpush1.msra.mxu0 %v384_v10  ;;  %v454_v26 = vld [vmem:[%s1287_s8 + $0xb0] sm:$0xff]  ;;  %858 = vmatprep.subr.mxu1 %v455_v25  ;;  %v453_v28 = vld [vmem:[%s1287_s8 + $0xa8] sm:$0xff]  ;;  %v344_v29 = vld [vmem:[%s1266_s30 + $0x40] sm:$0xff] }
  0x19   : > { %705 = vmatprep.subr.mxu0 %v359_v11  ;;  %859 = vmatpush1.msra.mxu1 %v454_v26  ;;  %v452_v30 = vld [vmem:[%s1287_s8 + $0xa0] sm:$0xff]  ;;  %v451_v31 = vld [vmem:[%s1287_s8 + $0x98] sm:$0xff]  ;;  %v450_v33 = vld [vmem:[%s1287_s8 + $0x90] sm:$0xff] }
  0x1a   : > { %706 = vmatpush1.msra.mxu0 %v358_v12  ;;  %v343_v32 = vld [vmem:[%s1266_s30 + $0x38] sm:$0xff]  ;;  %860 = vmatprep.subr.mxu1 %v453_v28  ;;  %v342_v34 = vld [vmem:[%s1266_s30 + $0x30] sm:$0xff]  ;;  %v449_v35 = vld [vmem:[%s1287_s8 + $0x88] sm:$0xff] }
  0x1b   : > { %707 = vmatprep.subr.mxu0 %v357_v13  ;;  %861 = vmatpush1.msra.mxu1 %v452_v30  ;;  %v341_v36 = vld [vmem:[%s1266_s30 + $0x28] sm:$0xff]  ;;  %v448_v37 = vld [vmem:[%s1287_s8 + $0x80] sm:$0xff]  ;;  %v339_v40 = vld [vmem:[%s1266_s30 + $0x18] sm:$0xff] }
  0x1c   : > { %708 = vmatpush1.msra.mxu0 %v356_v14  ;;  %862 = vmatprep.subr.mxu1 %v451_v31  ;;  %v340_v38 = vld [vmem:[%s1266_s30 + $0x20] sm:$0xff]  ;;  %v338_v41 = vld [vmem:[%s1266_s30 + $0x10] sm:$0xff]  ;;  %v337_v42 = vld [vmem:[%s1266_s30 + $0x8] sm:$0xff] }
  0x1d   : > { %709 = vmatprep.subr.mxu0 %v355_v15  ;;  %863 = vmatpush1.msra.mxu1 %v450_v33  ;;  %v336_v44 = vld [vmem:[%s1266_s30] sm:$0xff]  ;;  %v447_v47 = vld [vmem:[%s1287_s8 + $0x78] sm:$0xff]  ;;  %v446_v48 = vld [vmem:[%s1287_s8 + $0x70] sm:$0xff] }
  0x1e   : > { %710 = vmatpush1.msra.mxu0 %v354_v16  ;;  %864 = vmatprep.subr.mxu1 %v449_v35  ;;  %v445_v50 = vld [vmem:[%s1287_s8 + $0x68] sm:$0xff]  ;;  %v444_v52 = vld [vmem:[%s1287_s8 + $0x60] sm:$0xff]  ;;  %v443_v54 = vld [vmem:[%s1287_s8 + $0x58] sm:$0xff] }
  0x1f   : > { %711 = vmatprep.subr.mxu0 %v353_v17  ;;  %865 = vmatpush1.msra.mxu1 %v448_v37  ;;  %v442_v55 = vld [vmem:[%s1287_s8 + $0x50] sm:$0xff]  ;;  %v441_v57 = vld [vmem:[%s1287_s8 + $0x48] sm:$0xff]  ;;  %v440_v59 = vld [vmem:[%s1287_s8 + $0x40] sm:$0xff] }
  0x20   : > { %712 = vmatpush1.msra.mxu0 %v352_v18  ;;  %1127 = vmatmul.mubr.msk.f32.vlgmr.msra.gmra.mxu1 %vm660_vm0, %v482_v39  ;;  %v439_v61 = vld [vmem:[%s1287_s8 + $0x38] sm:$0xff]  ;;  %v438_v62 = vld [vmem:[%s1287_s8 + $0x30] sm:$0xff]  ;;  %v437_v0 = vld [vmem:[%s1287_s8 + $0x28] sm:$0xff] }
  0x21   : > { %713 = vmatprep.subr.mxu0 %v351_v19  ;;  %904 = vmatprep.mubr.f32.mxu1 %v1194_v1  ;;  %v594_v63 = vld [vmem:[%s1547_s4 + $0x30] sm:$0xff]  ;;  %v595_v2 = vld [vmem:[%s1547_s4 + $0x38] sm:$0xff]  ;;  %v436_v3 = vld [vmem:[%s1287_s8 + $0x20] sm:$0xff] }
  0x22   : > { %714 = vmatpush1.msra.mxu0 %v350_v20  ;;  %627 = vperm.xlu1 %1169, %v593_v58   ;;  %v494_v4 = vld [vmem:[%s1546_s3 + $0x70] sm:$0xff]  ;;  %v435_v5 = vld [vmem:[%s1287_s8 + $0x18] sm:$0xff]  ;;  %v596_v7 = vld [vmem:[%s1547_s4 + $0x40] sm:$0xff] }
  0x23   : > { %715 = vmatprep.subr.mxu0 %v349_v21  ;;  %632 = vperm.xlu0 %1168, %v594_v63   ;;  %v434_v6 = vld [vmem:[%s1287_s8 + $0x10] sm:$0xff]  ;;  %v433_v8 = vld [vmem:[%s1287_s8 + $0x8] sm:$0xff]  ;;  %v432_v10 = vld [vmem:[%s1287_s8] sm:$0xff] }
  0x24   : > { %716 = vmatpush1.msra.mxu0 %v348_v22  ;;  %1128 = vmatmul.mubr.msk.f32.gmra.mxu1 %vm660_vm0, %v485_v43  ;;  %v597_v9 = vld [vmem:[%s1547_s4 + $0x48] sm:$0xff]  ;;  %v407_v12 = vld [vmem:[%s1254_s27 + $0xb8] sm:$0xff]  ;;  %v406_v13 = vld [vmem:[%s1254_s27 + $0xb0] sm:$0xff] }
  0x25   : > { %717 = vmatprep.subr.mxu0 %v347_v23  ;;  %910 = vmatprep.mubr.f32.mxu1 %v1194_v1  ;;  %v497_v11 = vld [vmem:[%s1546_s3 + $0x88] sm:$0xff]  ;;  %v598_v14 = vld [vmem:[%s1547_s4 + $0x50] sm:$0xff]  ;;  %v599_v16 = vld [vmem:[%s1547_s4 + $0x58] sm:$0xff] }
  0x26   : > { %718 = vmatpush1.msra.mxu0 %v346_v24  ;;  %637 = vperm.xlu1 %1169, %v595_v2   ;;  %v405_v15 = vld [vmem:[%s1254_s27 + $0xa8] sm:$0xff]  ;;  %v404_v17 = vld [vmem:[%s1254_s27 + $0xa0] sm:$0xff]  ;;  %v403_v19 = vld [vmem:[%s1254_s27 + $0x98] sm:$0xff] }
  0x27   : > { %719 = vmatprep.subr.mxu0 %v345_v27  ;;  %642 = vperm.xlu0 %1168, %v596_v7   ;;  %v500_v18 = vld [vmem:[%s1546_s3 + $0xa0] sm:$0xff]  ;;  %v402_v20 = vld [vmem:[%s1254_s27 + $0x90] sm:$0xff]  ;;  %v401_v21 = vld [vmem:[%s1254_s27 + $0x88] sm:$0xff] }
  0x28   : > { %720 = vmatpush1.msra.mxu0 %v344_v29  ;;  %1129 = vmatmul.mubr.msk.f32.gmra.mxu1 %vm660_vm0, %v488_v53  ;;  %v400_v22 = vld [vmem:[%s1254_s27 + $0x80] sm:$0xff]  ;;  %v503_v23 = vld [vmem:[%s1546_s3 + $0xb8] sm:$0xff]  ;;  %v398_v25 = vld [vmem:[%s1254_s27 + $0x70] sm:$0xff] }
  0x29   : > { %721 = vmatprep.subr.mxu0 %v343_v32  ;;  %916 = vmatprep.mubr.f32.mxu1 %v1194_v1  ;;  %v399_v24 = vld [vmem:[%s1254_s27 + $0x78] sm:$0xff]  ;;  %v397_v26 = vld [vmem:[%s1254_s27 + $0x68] sm:$0xff]  ;;  %v396_v27 = vld [vmem:[%s1254_s27 + $0x60] sm:$0xff] }
  0x2a   : > { %722 = vmatpush1.msra.mxu0 %v342_v34  ;;  %647 = vperm.xlu1 %1169, %v597_v9   ;;  %v506_v28 = vld [vmem:[%s1546_s3 + $0xd0] sm:$0xff]  ;;  %v395_v29 = vld [vmem:[%s1254_s27 + $0x58] sm:$0xff]  ;;  %v393_v31 = vld [vmem:[%s1254_s27 + $0x48] sm:$0xff] }
  0x2b   : > { %723 = vmatprep.subr.mxu0 %v341_v36  ;;  %652 = vperm.xlu0 %1168, %v598_v14   ;;  %v394_v30 = vld [vmem:[%s1254_s27 + $0x50] sm:$0xff]  ;;  %v392_v32 = vld [vmem:[%s1254_s27 + $0x40] sm:$0xff]  ;;  %v509_v33 = vld [vmem:[%s1546_s3 + $0xe8] sm:$0xff] }
  0x2c   : > { %724 = vmatpush1.msra.mxu0 %v340_v38  ;;  %1130 = vmatmul.mubr.msk.f32.gmra.mxu1 %vm660_vm0, %v491_v60  ;;  %v480_v34 = vld [vmem:[%s1546_s3] sm:$0xff]  ;;  %v483_v37 = vld [vmem:[%s1546_s3 + $0x18] sm:$0xff]  ;;  %v501_v49 = vld [vmem:[%s1546_s3 + $0xa8] sm:$0xff] }
  0x2d   : > { %725 = vmatprep.subr.mxu0 %v339_v40  ;;  %922 = vmatprep.mubr.f32.mxu1 %v1194_v1  ;;  %v484_v35 = vld [vmem:[%s1546_s3 + $0x20] sm:$0xff]  ;;  %v487_v38 = vld [vmem:[%s1546_s3 + $0x38] sm:$0xff]  ;;  %v486_v40 = vld [vmem:[%s1546_s3 + $0x30] sm:$0xff] }
  0x2e   : > { %726 = vmatpush1.msra.mxu0 %v338_v41  ;;  %657 = vperm.xlu1 %1169, %v599_v16   ;;  %v512_v36 = vld [vmem:[%s1546_s3 + $0x100] sm:$0xff]  ;;  %v515_v39 = vld [vmem:[%s1546_s3 + $0x118] sm:$0xff]  ;;  %v490_v41 = vld [vmem:[%s1546_s3 + $0x50] sm:$0xff] }
  0x2f   : > { %727 = vmatprep.subr.mxu0 %v337_v42  ;;  %v493_v42 = vld [vmem:[%s1546_s3 + $0x68] sm:$0xff]  ;;  %v492_v43 = vld [vmem:[%s1546_s3 + $0x60] sm:$0xff]  ;;  %v495_v45 = vld [vmem:[%s1546_s3 + $0x78] sm:$0xff] }
  0x30   : > { %728 = vmatpush1.msra.mxu0 %v336_v44  ;;  %1131 = vmatmul.mubr.msk.f32.gmra.mxu1 %vm660_vm0, %v494_v4  ;;  %v496_v44 = vld [vmem:[%s1546_s3 + $0x80] sm:$0xff]  ;;  %v499_v46 = vld [vmem:[%s1546_s3 + $0x98] sm:$0xff]  ;;  %v514_v56 = vld [vmem:[%s1546_s3 + $0x110] sm:$0xff] }
  0x31   : > { %729 = vmatprep.subr.mxu0 %v447_v47  ;;  %928 = vmatprep.mubr.f32.mxu1 %v1194_v1  ;;  %v498_v47 = vld [vmem:[%s1546_s3 + $0x90] sm:$0xff]  ;;  %v504_v51 = vld [vmem:[%s1546_s3 + $0xc0] sm:$0xff]  ;;  %v507_v53 = vld [vmem:[%s1546_s3 + $0xd8] sm:$0xff] }
  0x32   : > { %730 = vmatpush2.msra.mxu0 %v446_v48  ;;  %v502_v48 = vld [vmem:[%s1546_s3 + $0xb0] sm:$0xff] }
  0x33   : > { %731 = vmatprep.subr.mxu0 %v445_v50  ;;  %v505_v50 = vld [vmem:[%s1546_s3 + $0xc8] sm:$0xff] }
  0x34   : > { %732 = vmatpush2.msra.mxu0 %v444_v52  ;;  %1132 = vmatmul.mubr.msk.f32.gmra.mxu1 %vm660_vm0, %v497_v11  ;;  %v508_v52 = vld [vmem:[%s1546_s3 + $0xe0] sm:$0xff] }
  0x35   : > { %733 = vmatprep.subr.mxu0 %v443_v54  ;;  %934 = vmatprep.mubr.f32.mxu1 %v1194_v1  ;;  %v511_v54 = vld [vmem:[%s1546_s3 + $0xf8] sm:$0xff] }
  0x36   : > { %734 = vmatpush2.msra.mxu0 %v442_v55  ;;  %v510_v55 = vld [vmem:[%s1546_s3 + $0xf0] sm:$0xff] }
  0x37   : > { %735 = vmatprep.subr.mxu0 %v441_v57  ;;  %v513_v57 = vld [vmem:[%s1546_s3 + $0x108] sm:$0xff] }
  0x38   : > { %736 = vmatpush2.msra.mxu0 %v440_v59  ;;  %1133 = vmatmul.mubr.msk.f32.gmra.mxu1 %vm660_vm0, %v500_v18 }
  0x39   : > { %737 = vmatprep.subr.mxu0 %v439_v61  ;;  %940 = vmatprep.mubr.f32.mxu1 %v1194_v1 }
  0x3a   : > { %738 = vmatpush2.msra.mxu0 %v438_v62 }
  0x3b   : > { %739 = vmatprep.subr.mxu0 %v437_v0 }
  0x3c   : > { %740 = vmatpush2.msra.mxu0 %v436_v3  ;;  %1134 = vmatmul.mubr.msk.f32.gmra.mxu1 %vm660_vm0, %v503_v23 }
  0x3d   : > { %741 = vmatprep.subr.mxu0 %v435_v5  ;;  %946 = vmatprep.mubr.f32.mxu1 %v1194_v1 }
  0x3e   : > { %742 = vmatpush2.msra.mxu0 %v434_v6 }
  0x3f   : > { %743 = vmatprep.subr.mxu0 %v433_v8 }
  0x40   : > { %744 = vmatpush2.msra.mxu0 %v432_v10  ;;  %1135 = vmatmul.mubr.msk.f32.gmra.mxu1 %vm660_vm0, %v506_v28 }
  0x41   : > { %745 = vmatprep.subr.mxu0 %v407_v12  ;;  %952 = vmatprep.mubr.f32.mxu1 %v1194_v1 }
  0x42   : > { %746 = vmatpush2.msra.mxu0 %v406_v13 }
  0x43   : > { %747 = vmatprep.subr.mxu0 %v405_v15 }
  0x44   : > { %748 = vmatpush2.msra.mxu0 %v404_v17  ;;  %1136 = vmatmul.mubr.msk.f32.gmra.mxu1 %vm660_vm0, %v509_v33 }
  0x45   : > { %749 = vmatprep.subr.mxu0 %v403_v19  ;;  %958 = vmatprep.mubr.f32.mxu1 %v1194_v1 }
  0x46   : > { %750 = vmatpush2.msra.mxu0 %v402_v20 }
  0x47   : > { %751 = vmatprep.subr.mxu0 %v401_v21 }
  0x48   : > { %752 = vmatpush2.msra.mxu0 %v400_v22  ;;  %1137 = vmatmul.mubr.msk.f32.gmra.mxu1 %vm660_vm0, %v512_v36 }
  0x49   : > { %753 = vmatprep.subr.mxu0 %v399_v24  ;;  %964 = vmatprep.mubr.f32.mxu1 %v1194_v1  ;;  %v489_v1 = vld [vmem:[%s1546_s3 + $0x48] sm:$0xff] }
  0x4a   : > { %754 = vmatpush2.msra.mxu0 %v398_v25 }
  0x4b   : > { %755 = vmatprep.subr.mxu0 %v397_v26 }
  0x4c   : > { %756 = vmatpush2.msra.mxu0 %v396_v27  ;;  %1138 = vmatmul.mubr.msk.f32.gmra.mxu1 %vm660_vm0, %v515_v39 }
  0x4d   : > { %757 = vmatprep.subr.mxu0 %v395_v29 }
  0x4e   : > { %758 = vmatpush2.msra.mxu0 %v394_v30 }
  0x4f   : > { %759 = vmatprep.subr.mxu0 %v393_v31 }
  0x50   : > { %760 = vmatpush2.msra.mxu0 %v392_v32 }
  0x51   : > { %762 = vmatmul.mubr.f32.vlgmr.msra.gmra.mxu0 %v480_v34 }
  0x52   : > { %767 = vmatprep.mubr.f32.mxu0 %v484_v35 }
  0x55   : > { %768 = vmatmul.mubr.f32.gmra.mxu0 %v483_v37 }
  0x56   : > { %773 = vmatprep.mubr.f32.mxu0 %v487_v38 }
  0x59   : > { %774 = vmatmul.mubr.f32.gmra.mxu0 %v486_v40 }
  0x5a   : > { %779 = vmatprep.mubr.f32.mxu0 %v490_v41 }
  0x5d   : > { %780 = vmatmul.mubr.f32.gmra.mxu0 %v489_v1 }
  0x5e   : > { %785 = vmatprep.mubr.f32.mxu0 %v493_v42 }
  0x61   : > { %786 = vmatmul.mubr.f32.gmra.mxu0 %v492_v43 }
  0x62   : > { %791 = vmatprep.mubr.f32.mxu0 %v496_v44 }
  0x65   : > { %792 = vmatmul.mubr.f32.gmra.mxu0 %v495_v45 }
  0x66   : > { %797 = vmatprep.mubr.f32.mxu0 %v499_v46 }
  0x69   : > { %798 = vmatmul.mubr.f32.gmra.mxu0 %v498_v47 }
  0x6a   : > { %803 = vmatprep.mubr.f32.mxu0 %v502_v48 }
  0x6d   : > { %804 = vmatmul.mubr.f32.gmra.mxu0 %v501_v49 }
  0x6e   : > { %809 = vmatprep.mubr.f32.mxu0 %v505_v50 }
  0x71   : > { %810 = vmatmul.mubr.f32.gmra.mxu0 %v504_v51 }
  0x72   : > { %815 = vmatprep.mubr.f32.mxu0 %v508_v52 }
  0x75   : > { %816 = vmatmul.mubr.f32.gmra.mxu0 %v507_v53 }
  0x76   : > { %821 = vmatprep.mubr.f32.mxu0 %v511_v54 }
  0x79   : > { %822 = vmatmul.mubr.f32.gmra.mxu0 %v510_v55 }
  0x7a   : > { %827 = vmatprep.mubr.f32.mxu0 %v514_v56 }
  0x7d   : > { %828 = vmatmul.mubr.f32.gmra.mxu0 %v513_v57 }
  0x8a   : > { %v603_v5 = vpop.permute.xlu0 %602  ;;  %v613_v18 = vpop.permute.xlu1 %612 }
  0x8e   : > { %v608_v11 = vpop.permute.xlu0 %607 }
  0x8f   : > { %v618_v28 = vpop.permute.xlu1 %617 }
  0x92   : > { %v623_v36 = vpop.permute.xlu0 %622 }
  0x9d   : > { %v628_v42 = vpop.permute.xlu1 %627 }
  0x9e   : > { %v633_v50 = vpop.permute.xlu0 %632 }
  0xe0   : > { %v900_v58 = vpop.f32.mrf.mxu1 }
  0xe2   : > { %v902_v59 = vpop.f32.mrf.mxu1 }
  0xe4   : > { %v906_v60 = vpop.f32.mrf.mxu1 }
  0xe6   : > { %v908_v61 = vpop.f32.mrf.mxu1 }
  0xe8   : > { %v912_v62 = vpop.f32.mrf.mxu1 }
  0xea   : > { %v914_v63 = vpop.f32.mrf.mxu1 }
  0xec   : > { %v918_v0 = vpop.f32.mrf.mxu1 }
  0xee   : > { %v920_v2 = vpop.f32.mrf.mxu1 }
  0xf0   : > { %v924_v3 = vpop.f32.mrf.mxu1 }
  0xf2   : > { %v926_v4 = vpop.f32.mrf.mxu1 }
  0xf4   : > { %v930_v6 = vpop.f32.mrf.mxu1 }
  0xf6   : > { %v932_v8 = vpop.f32.mrf.mxu1 }
  0xf8   : > { %v936_v15 = vpop.f32.mrf.mxu1 }
  0xfa   : > { %v938_v23 = vpop.f32.mrf.mxu1 }
  0xfc   : > { %v942_v31 = vpop.f32.mrf.mxu1 }
  0xfe   : > { %v944_v39 = vpop.f32.mrf.mxu1 }
 0x100   : > { %v948_v46 = vpop.f32.mrf.mxu1 }
 0x102   : > { %v950_v54 = vpop.f32.mrf.mxu1 }
 0x111   : > { %v763_v7 = vpop.f32.mrf.mxu0 }
 0x112   : > { %v764_v9 = vadd.f32 %v763_v7, %v603_v5 }
 0x113   : > { %v765_v10 = vpop.f32.mrf.mxu0 }
 0x114   : > { %v901_v12 = vadd.f32 %v900_v58, %v764_v9  ;;  %v766_v13 = vadd.f32 %v765_v10, %v603_v5  ;;  %v638_v58 = vpop.permute.xlu1 %637 }
 0x115   : > { %v769_v14 = vpop.f32.mrf.mxu0 }
 0x116   : > { %971 = vst [vmem:[%s1508_s28] sm:$0xff] %v901_v12  ;;  %v903_v16 = vadd.f32 %v902_v59, %v766_v13  ;;  %v770_v17 = vadd.f32 %v769_v14, %v608_v11 }
 0x117   : > { %v771_v19 = vpop.f32.mrf.mxu0 }
 0x118   : > { %972 = vst [vmem:[%s1508_s28 + $0x8] sm:$0xff] %v903_v16  ;;  %v907_v20 = vadd.f32 %v906_v60, %v770_v17  ;;  %v772_v21 = vadd.f32 %v771_v19, %v608_v11  ;;  %v648_v11 = vpop.permute.xlu1 %647 }
 0x119   : > { %v775_v22 = vpop.f32.mrf.mxu0 }
 0x11a   : > { %973 = vst [vmem:[%s1508_s28 + $0x10] sm:$0xff] %v907_v20  ;;  %v909_v24 = vadd.f32 %v908_v61, %v772_v21  ;;  %v776_v25 = vadd.f32 %v775_v22, %v613_v18 }
 0x11b   : > { %v777_v26 = vpop.f32.mrf.mxu0 }
 0x11c   : > { %974 = vst [vmem:[%s1508_s28 + $0x18] sm:$0xff] %v909_v24  ;;  %v913_v27 = vadd.f32 %v912_v62, %v776_v25  ;;  %v778_v29 = vadd.f32 %v777_v26, %v613_v18  ;;  %v954_v62 = vpop.f32.mrf.mxu1 }
 0x11d   : > { %v781_v30 = vpop.f32.mrf.mxu0 }
 0x11e   : > { %975 = vst [vmem:[%s1508_s28 + $0x20] sm:$0xff] %v913_v27  ;;  %v915_v32 = vadd.f32 %v914_v63, %v778_v29  ;;  %v782_v33 = vadd.f32 %v781_v30, %v618_v28  ;;  %v956_v7 = vpop.f32.mrf.mxu1  ;;  %v658_v27 = vpop.permute.xlu1 %657 }
 0x11f   : > { %v783_v34 = vpop.f32.mrf.mxu0 }
 0x120   : > { %976 = vst [vmem:[%s1508_s28 + $0x28] sm:$0xff] %v915_v32  ;;  %v919_v35 = vadd.f32 %v918_v0, %v782_v33  ;;  %v784_v37 = vadd.f32 %v783_v34, %v618_v28 }
 0x121   : > { %v787_v38 = vpop.f32.mrf.mxu0 }
 0x122   : > { %977 = vst [vmem:[%s1508_s28 + $0x30] sm:$0xff] %v919_v35  ;;  %v921_v40 = vadd.f32 %v920_v2, %v784_v37  ;;  %v788_v41 = vadd.f32 %v787_v38, %v623_v36 }
 0x123   : > { %v789_v1 = vpop.f32.mrf.mxu0 }
 0x124   : > { %978 = vst [vmem:[%s1508_s28 + $0x38] sm:$0xff] %v921_v40  ;;  %v925_v43 = vadd.f32 %v924_v3, %v788_v41  ;;  %v790_v44 = vadd.f32 %v789_v1, %v623_v36  ;;  %v643_v3 = vpop.permute.xlu0 %642 }
 0x125   : > { %v793_v45 = vpop.f32.mrf.mxu0 }
 0x126   : > { %979 = vst [vmem:[%s1508_s28 + $0x40] sm:$0xff] %v925_v43  ;;  %v927_v47 = vadd.f32 %v926_v4, %v790_v44  ;;  %v794_v48 = vadd.f32 %v793_v45, %v628_v42 }
 0x127   : > { %v795_v49 = vpop.f32.mrf.mxu0 }
 0x128   : > { %980 = vst [vmem:[%s1508_s28 + $0x48] sm:$0xff] %v927_v47  ;;  %v931_v51 = vadd.f32 %v930_v6, %v794_v48  ;;  %v796_v52 = vadd.f32 %v795_v49, %v628_v42  ;;  %v653_v19 = vpop.permute.xlu0 %652 }
 0x129   : > { %v799_v53 = vpop.f32.mrf.mxu0 }
 0x12a   : > { %981 = vst [vmem:[%s1508_s28 + $0x50] sm:$0xff] %v931_v51  ;;  %v933_v55 = vadd.f32 %v932_v8, %v796_v52  ;;  %v800_v56 = vadd.f32 %v799_v53, %v633_v50 }
 0x12b   : > { %v801_v57 = vpop.f32.mrf.mxu0 }
 0x12c   : > { %982 = vst [vmem:[%s1508_s28 + $0x58] sm:$0xff] %v933_v55  ;;  %v937_v59 = vadd.f32 %v936_v15, %v800_v56  ;;  %v802_v60 = vadd.f32 %v801_v57, %v633_v50  ;;  %v960_v15 = vpop.f32.mrf.mxu1 }
 0x12d   : > { %v805_v61 = vpop.f32.mrf.mxu0 }
 0x12e   : > { %983 = vst [vmem:[%s1508_s28 + $0x60] sm:$0xff] %v937_v59  ;;  %v939_v63 = vadd.f32 %v938_v23, %v802_v60  ;;  %v806_v0 = vadd.f32 %v805_v61, %v638_v58  ;;  %v962_v23 = vpop.f32.mrf.mxu1 }
 0x12f   : > { %v807_v2 = vpop.f32.mrf.mxu0 }
 0x130   : > { %984 = vst [vmem:[%s1508_s28 + $0x68] sm:$0xff] %v939_v63  ;;  %v943_v4 = vadd.f32 %v942_v31, %v806_v0  ;;  %v808_v5 = vadd.f32 %v807_v2, %v638_v58  ;;  %v966_v31 = vpop.f32.mrf.mxu1 }
 0x131   : > { %v811_v6 = vpop.f32.mrf.mxu0 }
 0x132   : > { %985 = vst [vmem:[%s1508_s28 + $0x70] sm:$0xff] %v943_v4  ;;  %v945_v8 = vadd.f32 %v944_v39, %v808_v5  ;;  %v812_v9 = vadd.f32 %v811_v6, %v643_v3  ;;  %v968_v37 = vpop.f32.mrf.mxu1 }
 0x133   : > { %v813_v10 = vpop.f32.mrf.mxu0 }
 0x134   : > { %986 = vst [vmem:[%s1508_s28 + $0x78] sm:$0xff] %v945_v8  ;;  %v949_v12 = vadd.f32 %v948_v46, %v812_v9  ;;  %v814_v13 = vadd.f32 %v813_v10, %v643_v3 }
 0x135   : > { %v817_v14 = vpop.f32.mrf.mxu0 }
 0x136   : > { %987 = vst [vmem:[%s1508_s28 + $0x80] sm:$0xff] %v949_v12  ;;  %v951_v16 = vadd.f32 %v950_v54, %v814_v13  ;;  %v818_v17 = vadd.f32 %v817_v14, %v648_v11 }
 0x137   : > { %v819_v18 = vpop.f32.mrf.mxu0 }
 0x138   : > { %988 = vst [vmem:[%s1508_s28 + $0x88] sm:$0xff] %v951_v16  ;;  %v955_v20 = vadd.f32 %v954_v62, %v818_v17  ;;  %v820_v21 = vadd.f32 %v819_v18, %v648_v11 }
 0x139   : > { %v823_v22 = vpop.f32.mrf.mxu0 }
 0x13a   : > { %989 = vst [vmem:[%s1508_s28 + $0x90] sm:$0xff] %v955_v20  ;;  %v957_v24 = vadd.f32 %v956_v7, %v820_v21  ;;  %v824_v25 = vadd.f32 %v823_v22, %v653_v19 }
 0x13b   : > { %v825_v26 = vpop.f32.mrf.mxu0 }
 0x13c   : > { %990 = vst [vmem:[%s1508_s28 + $0x98] sm:$0xff] %v957_v24  ;;  %v961_v28 = vadd.f32 %v960_v15, %v824_v25  ;;  %v826_v29 = vadd.f32 %v825_v26, %v653_v19 }
 0x13d   : > { %v829_v30 = vpop.f32.mrf.mxu0 }
 0x13e   : > { %991 = vst [vmem:[%s1508_s28 + $0xa0] sm:$0xff] %v961_v28  ;;  %v963_v32 = vadd.f32 %v962_v23, %v826_v29  ;;  %v830_v33 = vadd.f32 %v829_v30, %v658_v27 }
 0x13f   : > { %v831_v34 = vpop.f32.mrf.mxu0 }
 0x140   : > { %992 = vst [vmem:[%s1508_s28 + $0xa8] sm:$0xff] %v963_v32  ;;  %v967_v35 = vadd.f32 %v966_v31, %v830_v33  ;;  %v832_v36 = vadd.f32 %v831_v34, %v658_v27 }
 0x142   : > { %993 = vst [vmem:[%s1508_s28 + $0xb0] sm:$0xff] %v967_v35  ;;  %v969_v38 = vadd.f32 %v968_v37, %v832_v36 }
 0x144   : > { %994 = vst [vmem:[%s1508_s28 + $0xb8] sm:$0xff] %v969_v38 }
 0x145 PF: > { %s15_s20 = sadd.s32 1, %s1192_s20   ;;  %s1549_s18 = smov %s1188_s19 }
 0x146   : > { %p12_p5 = scmp.ge.s32.totalorder %s15_s20, 4   ;;  %s1550_s19 = smov %s1552_s21 }
 0x148   :  { %14 = sbr.rel (!%p12_p5) target bundleno = 2 (0x2), region = 76 }

</bundles_post_ra>
